<compile_context>
chip_gen: v6e
topology: v6e:2x2x1
jax: 0.10.0
libtpu: 0.0.40
codegen_flags: <defaults>
</compile_context>

<pallas_src>
import math
from typing import NamedTuple

import jax
import jax.numpy as jnp
from jax import lax
from jax.experimental import pallas as pl
from jax.experimental.pallas import tpu as pltpu

_MIB = 1024 * 1024


def _align(v: int, a: int) -> int:
    return -(-v // a) * a


def _vmem_budget_bytes() -> int:
    """~75% of physical VMEM: ≈96 MiB on v5e/v6e (128 MiB), ≈48 MiB on v7x (64 MiB)."""
    try:
        cap = int(pltpu.get_tpu_info().vmem_capacity_bytes)
    except Exception:
        cap = 64 * _MIB  # conservative fallback (v7x per-TC size)
    return max(32 * _MIB, min(int(cap * 0.75), 100 * _MIB))


def _tile_bytes(tm: int, tn: int, tk: int, in_isz: int, out_isz: int) -> int:
    """Double-buffered x/W/bias input tiles + double-buffered output + f32 acc."""
    return (2 * (tm * tk + tn * tk) * in_isz
            + 2 * tn * 4
            + 2 * tm * tn * out_isz
            + tm * tn * 4)


def _choose_tk(k_pad: int) -> int:
    """Pick tk to minimize K zero-padding (bounded so tiles stay VMEM-friendly)."""
    if k_pad <= 2048:
        return k_pad
    cands = range(512, 1537, 128)
    return min(cands, key=lambda c: (_align(k_pad, c) - k_pad, -c))


def _choose_tn(n_pad: int, tk: int, in_isz: int, budget: int, tm_assumed: int = 1024) -> int:
    tn = min(n_pad, 2048)
    while tn > 128 and _tile_bytes(tm_assumed, tn, tk, in_isz, 4) > budget:
        tn = max(128, (tn // 2) // 128 * 128)
    return tn


def _expert_matmul_kernel(x_ref, w_ref, b_ref, o_ref, acc_ref):
    """One (tm, tn) output tile, accumulated over the K grid axis.

    x_ref:   [tm, tk]            activation tile (compute dtype, e.g. bf16)
    w_ref:   [tn, tk]            weight tile in PyTorch [out, in] layout
    b_ref:   [1,  tn]            bias tile (f32)
    o_ref:   [tm, tn]            output tile (written on last K step)
    acc_ref: [tm, tn] f32 VMEM   accumulator, resident across K
    """
    k = pl.program_id(2)

    @pl.when(k == 0)
    def _init():
        acc_ref[...] = jnp.zeros_like(acc_ref)

    # x @ W.T without materializing a transpose: contract axis 1 of both.
    acc_ref[...] += lax.dot_general(
        x_ref[...],
        w_ref[...],
        dimension_numbers=(((1,), (1,)), ((), ())),
        preferred_element_type=jnp.float32,
    )

    @pl.when(k == pl.num_programs(2) - 1)
    def _finalize():
        o_ref[...] = (acc_ref[...] + b_ref[...]).astype(o_ref.dtype)


class PreparedExpert(NamedTuple):
    weight_p: jax.Array      # [n_tot, k_tot], compute dtype, torch [out,in] layout, zero-padded
    bias_p: jax.Array        # [1, n_tot], float32, zero-padded
    feature_in: int
    feature_out: int
    k_tot: int
    n_tot: int
    tk: int
    tn: int
    compute_dtype: jnp.dtype


def prepare_basic_expert(weight, bias, *, compute_dtype=jnp.bfloat16) -> PreparedExpert:
    """Hoisted, once-per-parameter work: cast weight to the MXU feed dtype and
    zero-pad weight/bias to tile-aligned shapes.  Reuse the result across calls."""
    feature_out, feature_in = weight.shape
    compute_dtype = jnp.dtype(compute_dtype)
    in_isz = compute_dtype.itemsize
    budget = _vmem_budget_bytes()

    k_pad = _align(max(feature_in, 1), 128)
    n_pad = _align(max(feature_out, 1), 128)

    tk = _choose_tk(k_pad)
    tn = _choose_tn(n_pad, tk, in_isz, budget)

    k_tot = _align(k_pad, tk)
    n_tot = _align(n_pad, tn)

    w_p = weight.astype(compute_dtype)
    if w_p.shape != (n_tot, k_tot):
        w_p = jnp.pad(w_p, ((0, n_tot - feature_out), (0, k_tot - feature_in)))

    b_p = bias.astype(jnp.float32).reshape(1, feature_out)
    if n_tot != feature_out:
        b_p = jnp.pad(b_p, ((0, 0), (0, n_tot - feature_out)))

    return PreparedExpert(w_p, b_p, feature_in, feature_out, k_tot, n_tot, tk, tn,
                          compute_dtype)


def basic_expert_apply(x, prep: PreparedExpert):
    """x: [..., feature_in] -> [..., feature_out] in x.dtype (== BasicExpert.forward)."""
    feature_in, feature_out = prep.feature_in, prep.feature_out
    if x.shape[-1] != feature_in:
        raise ValueError(f"expected last dim {feature_in}, got {x.shape[-1]}")

    lead_shape = x.shape[:-1]
    m = int(math.prod(lead_shape)) if lead_shape else 1
    out_dtype = x.dtype

    # Degenerate-shape guards (zero-sized batch / feature_out).
    if m == 0 or feature_out == 0:
        return jnp.zeros((*lead_shape, feature_out), out_dtype)

    compute_dtype = prep.compute_dtype
    in_isz = compute_dtype.itemsize
    out_isz = jnp.dtype(out_dtype).itemsize
    budget = _vmem_budget_bytes()

    sub = 16 if compute_dtype == jnp.bfloat16 else 8
    m_pad = _align(m, sub)

    # tm sized from the remaining VMEM budget given the (fixed) tn/tk.
    tm = min(m_pad, 2048)
    while tm > sub and _tile_bytes(tm, prep.tn, prep.tk, in_isz, out_isz) > budget:
        tm = max(sub, (tm // 2) // sub * sub)
    m_tot = _align(m_pad, tm)

    # Tiny-batch calls: split N into >=2 blocks so megacore / v7x's 2nd TC has work.
    tn = prep.tn
    if m_tot // tm == 1 and prep.n_tot // tn == 1 and tn % 256 == 0:
        tn //= 2

    x2d = x.reshape(m, feature_in).astype(compute_dtype)
    if (m_tot, prep.k_tot) != x2d.shape:
        x2d = jnp.pad(x2d, ((0, m_tot - m), (0, prep.k_tot - feature_in)))

    grid = (m_tot // tm, prep.n_tot // tn, prep.k_tot // prep.tk)

    est = _tile_bytes(tm, tn, prep.tk, in_isz, out_isz)
    vmem_limit = int(min(budget, max(est * 3 // 2, 32 * _MIB)))

    cost = pl.CostEstimate(
        flops=2 * m_tot * prep.n_tot * prep.k_tot,
        transcendentals=0,
        bytes_accessed=(x2d.size * in_isz
                        + prep.weight_p.size * in_isz
                        + prep.bias_p.size * 4
                        + m_tot * prep.n_tot * out_isz),
    )

    tk = prep.tk
    out_padded = pl.pallas_call(
        _expert_matmul_kernel,
        out_shape=jax.ShapeDtypeStruct((m_tot, prep.n_tot), out_dtype),
        grid_spec=pltpu.PrefetchScalarGridSpec(
            num_scalar_prefetch=0,
            grid=grid,
            in_specs=[
                pl.BlockSpec((tm, tk), lambda i, j, k: (i, k)),   # x
                pl.BlockSpec((tn, tk), lambda i, j, k: (j, k)),   # W (torch layout)
                pl.BlockSpec((1, tn), lambda i, j, k: (0, j)),    # bias (f32)
            ],
            out_specs=pl.BlockSpec((tm, tn), lambda i, j, k: (i, j)),
            scratch_shapes=[pltpu.VMEM((tm, tn), jnp.float32)],
        ),
        compiler_params=pltpu.CompilerParams(
            dimension_semantics=("parallel", "parallel", "arbitrary"),
            vmem_limit_bytes=vmem_limit,
        ),
        cost_estimate=cost,
    )(x2d, prep.weight_p, prep.bias_p)

    out2d = out_padded[:m, :feature_out]
    return out2d.reshape(*lead_shape, feature_out)


def basic_expert_forward(x, weight, bias, *, compute_dtype=jnp.bfloat16):
    """One-shot convenience: pads/casts params then applies.  For repeated calls
    use prepare_basic_expert() once and basic_expert_apply() per call.
    compute_dtype=jnp.float32 gives bit-faithful-to-f32 numerics (slower MXU)."""
    prep = prepare_basic_expert(weight, bias, compute_dtype=compute_dtype)
    return basic_expert_apply(x, prep)


def init_basic_expert_params(key, feature_in, feature_out, dtype=jnp.float32):
    """Deterministic init mirroring nn.Linear's default (kaiming-uniform-ish)."""
    k_w, k_b = jax.random.split(key)
    bound = 1.0 / math.sqrt(feature_in)
    weight = jax.random.uniform(
        k_w, (feature_out, feature_in), dtype=dtype, minval=-bound, maxval=bound)
    bias = jax.random.uniform(
        k_b, (feature_out,), dtype=dtype, minval=-bound, maxval=bound)
    return weight, bias


if __name__ == "__main__":
    key = jax.random.PRNGKey(0)
    k_x, k_p = jax.random.split(key)

    batch, seq, feature_in, feature_out = 2, 8, 32, 64
    x = jax.random.normal(k_x, (batch, seq, feature_in), dtype=jnp.float32)
    weight, bias = init_basic_expert_params(k_p, feature_in, feature_out)

    ref = x @ weight.T + bias

    # Default path: bf16 MXU feed, f32 accumulation, params prepared (padded) once.
    prep = prepare_basic_expert(weight, bias)
    out = jax.block_until_ready(basic_expert_apply(x, prep))
    assert out.shape == (batch, seq, feature_out)
    assert out.dtype == x.dtype
    # bf16 operands (f32 accumulation) => loosened tolerance vs f32 reference.
    assert jnp.allclose(out, ref, atol=1e-2, rtol=1e-2), \
        float(jnp.max(jnp.abs(out - ref)))

    # Exact-f32 path sanity check.
    out_f32 = jax.block_until_ready(
        basic_expert_forward(x, weight, bias, compute_dtype=jnp.float32))
    assert jnp.allclose(out_f32, ref, atol=1e-5, rtol=1e-5)

    print("KERNEL_OK")
</pallas_src>

<mosaic_0001>
module attributes {stable_mosaic.version = 11 : i64} {
  func.func @_expert_matmul_kernel(%arg0: i32, %arg1: i32, %arg2: i32, %arg3: memref<16x128xbf16, #tpu.memory_space<vmem>>, %arg4: memref<128x128xbf16, #tpu.memory_space<vmem>>, %arg5: memref<1x128xf32, #tpu.memory_space<vmem>>, %arg6: memref<16x128xf32, #tpu.memory_space<vmem>>, %arg7: memref<16x128xf32, #tpu.memory_space<vmem>>) attributes {dimension_semantics = [#tpu.dimension_semantics<parallel>, #tpu.dimension_semantics<parallel>, #tpu.dimension_semantics<arbitrary>], iteration_bounds = array<i64: 1, 1, 1>, scalar_prefetch = 0 : i64, scratch_operands = 1 : i64, tpu.core_type = #tpu.core_type<tc>, window_params = [{transform_indices = @transform_0, window_bounds = array<i64: 16, 128>}, {transform_indices = @transform_1, window_bounds = array<i64: 128, 128>}, {transform_indices = @transform_2, window_bounds = array<i64: 1, 128>}, {transform_indices = @transform_3, window_bounds = array<i64: 16, 128>}]} {
    %c0_i32 = arith.constant 0 : i32
    %0 = arith.cmpi eq, %arg2, %c0_i32 : i32
    %1 = arith.extui %0 : i1 to i32
    %c0_i32_0 = arith.constant 0 : i32
    %2 = arith.cmpi ne, %1, %c0_i32_0 : i32
    scf.if %2 {
      %cst_10 = arith.constant 0.000000e+00 : f32
      %12 = vector.broadcast %cst_10 : f32 to vector<16x128xf32>
      %c0_11 = arith.constant 0 : index
      %c0_12 = arith.constant 0 : index
      %13 = vector.load %arg7[%c0_11, %c0_12] : memref<16x128xf32, #tpu.memory_space<vmem>>, vector<16x128xf32>
      tpu.vector_store %arg7[%c0_11, %c0_12], %12 {strides = array<i32>} : memref<16x128xf32, #tpu.memory_space<vmem>>, vector<16x128xf32>,
    } else {
    }
    %c0 = arith.constant 0 : index
    %c0_1 = arith.constant 0 : index
    %3 = vector.load %arg7[%c0, %c0_1] : memref<16x128xf32, #tpu.memory_space<vmem>>, vector<16x128xf32>
    %c0_2 = arith.constant 0 : index
    %c0_3 = arith.constant 0 : index
    %4 = vector.load %arg3[%c0_2, %c0_3] : memref<16x128xbf16, #tpu.memory_space<vmem>>, vector<16x128xbf16>
    %c0_4 = arith.constant 0 : index
    %c0_5 = arith.constant 0 : index
    %5 = vector.load %arg4[%c0_4, %c0_5] : memref<128x128xbf16, #tpu.memory_space<vmem>>, vector<128x128xbf16>
    %cst = arith.constant dense<0.000000e+00> : vector<16x128xf32>
    %6 = tpu.matmul %4, %5, %cst {dimension_numbers = #tpu.dot_dimension_numbers<[1], [1], [0], [0], [0, 0, 1, 0], [], []>} : vector<16x128xbf16>, vector<128x128xbf16>, vector<16x128xf32> -> vector<16x128xf32>
    %7 = arith.addf %3, %6 : vector<16x128xf32>
    %c0_6 = arith.constant 0 : index
    %c0_7 = arith.constant 0 : index
    %8 = vector.load %arg7[%c0_6, %c0_7] : memref<16x128xf32, #tpu.memory_space<vmem>>, vector<16x128xf32>
    tpu.vector_store %arg7[%c0_6, %c0_7], %7 {strides = array<i32>} : memref<16x128xf32, #tpu.memory_space<vmem>>, vector<16x128xf32>,
    %c0_i32_8 = arith.constant 0 : i32
    %9 = arith.cmpi eq, %arg2, %c0_i32_8 : i32
    %10 = arith.extui %9 : i1 to i32
    %c0_i32_9 = arith.constant 0 : i32
    %11 = arith.cmpi ne, %10, %c0_i32_9 : i32
    scf.if %11 {
      %c0_10 = arith.constant 0 : index
      %c0_11 = arith.constant 0 : index
      %12 = vector.load %arg7[%c0_10, %c0_11] : memref<16x128xf32, #tpu.memory_space<vmem>>, vector<16x128xf32>
      %c0_12 = arith.constant 0 : index
      %c0_13 = arith.constant 0 : index
      %13 = vector.load %arg5[%c0_12, %c0_13] : memref<1x128xf32, #tpu.memory_space<vmem>>, vector<1x128xf32>
      %14 = vector.broadcast %13 : vector<1x128xf32> to vector<16x128xf32>
      %15 = arith.addf %12, %14 : vector<16x128xf32>
      %c0_14 = arith.constant 0 : index
      %c0_15 = arith.constant 0 : index
      %16 = vector.load %arg6[%c0_14, %c0_15] : memref<16x128xf32, #tpu.memory_space<vmem>>, vector<16x128xf32>
      tpu.vector_store %arg6[%c0_14, %c0_15], %15 {strides = array<i32>} : memref<16x128xf32, #tpu.memory_space<vmem>>, vector<16x128xf32>,
    } else {
    }
    return
  }
  func.func @transform_0(%arg0: i32, %arg1: i32, %arg2: i32) -> (i32, i32) {
    %c0_i32 = arith.constant 0 : i32
    return %arg0, %arg2 : i32, i32
  }
  func.func @transform_1(%arg0: i32, %arg1: i32, %arg2: i32) -> (i32, i32) {
    %c0_i32 = arith.constant 0 : i32
    return %arg1, %arg2 : i32, i32
  }
  func.func @transform_2(%arg0: i32, %arg1: i32, %arg2: i32) -> (i32, i32) {
    %c0_i32 = arith.constant 0 : i32
    %c0_i32_0 = arith.constant 0 : i32
    return %c0_i32, %arg1 : i32, i32
  }
  func.func @transform_3(%arg0: i32, %arg1: i32, %arg2: i32) -> (i32, i32) {
    %c0_i32 = arith.constant 0 : i32
    return %arg0, %arg1 : i32, i32
  }
}

</mosaic_0001>

<bundles_post_ra>
// kernel: tpu_custom_call.1
= control target key start
LH: loop header
LB: loop body
LE: loop exit
PB: predicated region body
PF: predicated region fallthrough
CT: control target
= control target key end

     0   :  { %8 = vsyncpa [#allocation4], 0  ;;  %s367_s0 = inlined_call_operand.hbm [shape: bf16[16,128], index: 0, kind: input, shape index: {}]   ;;  %s368_s1 = inlined_call_operand.hbm [shape: bf16[128,128], index: 1, kind: input, shape index: {}]   ;;  %s369_s2 = inlined_call_operand.vmem [shape: f32[1,128], index: 2, kind: input, shape index: {}]   ;;  %s370_s3 = inlined_call_operand.hbm [shape: f32[16,128], index: 3, kind: output, shape index: {}]  }
   0x1   :  { %9 = vsyncpa [#allocation7], 0 }
   0x2   :  { %10 = vsyncpa [#allocation5], 0  ;;  %s326_s12 = smov [#allocation3]  }
   0x3   :  { %s16_s13 = sshll.u32 %s326_s12, 4  ;;  %s17_s13 = int_to_ptr.vmem [resolvable:$true] %s16_s13 }
   0x4   :  { %s268_s14 = scalar_lea.vmem %s17_s13, 128  ;;  %p273_p1 = scmp.lt.s32.totalorder %s17_s13, %s17_s13 }
   0x5   :  { %p269_p0 = scmp.ne.s32.totalorder %s17_s13, %s268_s14  ;;  %p274_p2 = scmp.lt.s32.totalorder %s268_s14, %s268_s14 }
   0x7   :  { %p275_p3 = por %p274_p2, %p273_p1 }
   0x9   :  { %p276_p4 = pnand %p275_p3, %p269_p0 }
   0xb   :  { %279 = shalt.err (!%p276_p4)
}
   0xc   :  { %s327_s15 = smov 64   ;;  %s328_s16 = smov 4  }
   0xd   :  { %22 = dma.hbm_to_vmem [thread:$0]  %s367_s0, 128, %s17_s13, [#allocation4], %s327_s15, %s327_s15, %s328_s16  }
   0xe   :  { %s329_s19 = smov [#allocation6]  }
   0xf   :  { %s28_s20 = sshll.u32 %s329_s19, 4  ;;  %s29_s20 = int_to_ptr.vmem [resolvable:$true] %s28_s20 }
  0x10   :  { %s288_s21 = scalar_lea.vmem %s29_s20, 1024  ;;  %p293_p6 = scmp.lt.s32.totalorder %s29_s20, %s29_s20 }
  0x11   :  { %p289_p5 = scmp.ne.s32.totalorder %s29_s20, %s288_s21  ;;  %p294_p7 = scmp.lt.s32.totalorder %s288_s21, %s288_s21 }
  0x13   :  { %p295_p8 = por %p294_p7, %p293_p6 }
  0x15   :  { %p296_p9 = pnand %p295_p8, %p289_p5 }
  0x17   :  { %299 = shalt.err (!%p296_p9)
}
  0x18   :  { %34 = dma.hbm_to_vmem [thread:$0]  %s368_s1, 1024, %s29_s20, [#allocation7], %s327_s15, %s327_s15, %s328_s16  }
  0x19   :  { %320 = dma.done.wait [#allocation4], 128  }
  0x1a   :  { %321 = vsyncadd [#allocation4], 4294967168 }
  0x1b   :  { %322 = dma.done.wait [#allocation7], 1024  }
  0x1c   :  { %323 = vsyncadd [#allocation7], 4294966272  ;;  %v330_v0 = vmov 0.0   ;;  %vm331_vm0 = vmmov 0   ;;  %v251_v1 = vld [vmem:[#allocation6 + $0x38] sm:$0xff]   ;;  %v252_v2 = vld [vmem:[#allocation6 + $0x30] sm:$0xff]  }
  0x1d   :  { %222 = vmatprep.subr.bf16.mxu0 %v330_v0  ;;  %238 = vmatprep.mubr.msk.bf16.mxu0 %vm331_vm0, %v330_v0  ;;  %v253_v3 = vld [vmem:[#allocation6 + $0x28] sm:$0xff]   ;;  %v254_v4 = vld [vmem:[#allocation6 + $0x20] sm:$0xff]   ;;  %v255_v5 = vld [vmem:[#allocation6 + $0x18] sm:$0xff]   ;;  %s332_s24 = smov [#allocation8]  }
  0x1e   :  { %223 = vmatpush3.bf16.xpose.msra.mxu0 %v251_v1  ;;  %v256_v6 = vld [vmem:[#allocation6 + $0x10] sm:$0xff]   ;;  %v257_v7 = vld [vmem:[#allocation6 + $0x8] sm:$0xff]   ;;  %v258_v8 = vld [vmem:[#allocation6] sm:$0xff]   ;;  %s190_s25 = sshll.u32 %s332_s24, 4  ;;  %s191_s25 = int_to_ptr.vmem [resolvable:$true] %s190_s25 }
  0x1f   :  { %224 = vmatprep.subr.bf16.mxu0 %v330_v0  ;;  %v259_v9 = vld [vmem:[#allocation3] sm:$0xff]   ;;  %s300_s26 = scalar_lea.vmem %s191_s25, 256  ;;  %p305_p11 = scmp.lt.s32.totalorder %s191_s25, %s191_s25 }
  0x20   :  { %v212_v10 = vld [vmem:[%s369_s2] ss:$0 sm:$0xff]  ;;  %p301_p10 = scmp.ne.s32.totalorder %s191_s25, %s300_s26  ;;  %p306_p12 = scmp.lt.s32.totalorder %s300_s26, %s300_s26 }
  0x22   :  { %p307_p13 = por %p306_p12, %p305_p11 }
  0x24   :  { %p308_p0 = pnand %p307_p13, %p301_p10 }
  0x26   :  { %225 = vmatpush3.bf16.xpose.msra.mxu0 %v252_v2 }
  0x27   :  { %226 = vmatprep.subr.bf16.mxu0 %v330_v0 }
  0x2e   :  { %227 = vmatpush3.bf16.xpose.msra.mxu0 %v253_v3 }
  0x2f   :  { %228 = vmatprep.subr.bf16.mxu0 %v330_v0 }
  0x36   :  { %229 = vmatpush3.bf16.xpose.msra.mxu0 %v254_v4 }
  0x37   :  { %230 = vmatprep.subr.bf16.mxu0 %v330_v0 }
  0x3e   :  { %231 = vmatpush3.bf16.xpose.msra.mxu0 %v255_v5 }
  0x3f   :  { %232 = vmatprep.subr.bf16.mxu0 %v330_v0 }
  0x46   :  { %233 = vmatpush3.bf16.xpose.msra.mxu0 %v256_v6 }
  0x47   :  { %234 = vmatprep.subr.bf16.mxu0 %v330_v0 }
  0x4e   :  { %235 = vmatpush3.bf16.xpose.msra.mxu0 %v257_v7 }
  0x4f   :  { %236 = vmatprep.subr.bf16.mxu0 %v330_v0 }
  0x56   :  { %237 = vmatpush3.bf16.xpose.msra.mxu0 %v258_v8 }
  0x5d   :  { %239 = vmatmul.mubr.bf16.vlgmr.msra.gmra.mxu0 %v259_v9 }
 0x11d   :  { %v158_v11 = vpop.f32.mrf.mxu0 }
 0x11e   :  { %v181_v12 = vadd.f32 %v212_v10, %v158_v11 }
 0x11f   :  { %v240_v13 = vpop.f32.mrf.mxu0 }
 0x120   :  { %183 = vst [vmem:[#allocation8] sm:$0xff] %v181_v12 }
 0x121   :  { %v161_v14 = vpop.f32.mrf.mxu0 }
 0x122   :  { %v182_v15 = vadd.f32 %v212_v10, %v161_v14 }
 0x123   :  { %v241_v16 = vpop.f32.mrf.mxu0 }
 0x124   :  { %184 = vst [vmem:[#allocation8 + $0x8] sm:$0xff] %v182_v15 }
 0x125   :  { %311 = shalt.err (!%p308_p0)
}
 0x126   :  { %s333_s27 = smov 128   ;;  %s334_s2 = smov 8  }
 0x127   :  { %196 = dma.vmem_to_hbm [thread:$0]  %s191_s25, 256, %s370_s3, [#allocation5], %s333_s27, %s333_s27, %s334_s2  }
 0x128   :  { %324 = dma.done.wait [#allocation5], 256  }
 0x129   :  { %325 = vsyncadd [#allocation5], 4294967040 }
 0x12a   :  { %200 = vsyncpa [#allocation4], 1 }
 0x12b   :  { %201 = vsyncpa [#allocation7], 1 }
 0x12c   :  { %202 = vsyncpa [#allocation5], 1 }

</bundles_post_ra>
